<compile_context>
chip_gen: v7x
topology: tpu7x:2x2x1
jax: 0.10.0
libtpu: 0.0.40
codegen_flags: <defaults>
</compile_context>

<pallas_src>
import math
import functools

import jax
import jax.numpy as jnp
from jax.experimental import pallas as pl
from jax.experimental.pallas import tpu as pltpu


def _fused_conv_model_kernel(channel_plan, H, W, nb, G, x_ref, mask_ref, *rest):
    """Runs all conv3x3 + bias + ReLU layers for one batch chunk.

    Shapes (Lb = nb*(H+2)*(W+2); lane axis = flattened padded spatial):
      x_ref    : (Cin0, Lb)          zero-padded input images, fp32
      mask_ref : (1, Lb)             1.0 at interior pixels, 0.0 at halo pixels
      rest     : w_0, b_0, ..., w_{d-1}, b_{d-1}, o_ref, act_scratch
        w_l    : (Cout_l, 9*Cin_l)   bf16, K ordered (dy, dx, cin)
        b_l    : (Cout_l, 1)         fp32
      o_ref    : (Cout_last, Lb)     fp32 (still padded; wrapper crops the halo)
      act      : (C_max, G+Lb+G)     fp32 VMEM scratch (guarded, padded activations)
    """
    act_ref = rest[-1]
    o_ref = rest[-2]
    wb = rest[:-2]

    Hp, Wp = H + 2, W + 2
    Lb = nb * Hp * Wp
    depth = len(channel_plan) - 1

    # Fresh guarded/padded activation buffer for this batch chunk.
    act_ref[...] = jnp.zeros_like(act_ref)
    act_ref[0:channel_plan[0], G:G + Lb] = x_ref[...]

    mask = mask_ref[...]                      # (1, Lb), broadcasts over channels

    for l in range(depth):
        cin, cout = channel_plan[l], channel_plan[l + 1]
        w = wb[2 * l][...]                    # (cout, 9*cin) bf16
        b = wb[2 * l + 1][...]                # (cout, 1)     fp32

        xv = act_ref[0:cin, :]                # (cin, G+Lb+G) fp32, one load

        # im2col: 9 statically lane-shifted windows stacked along K.
        windows = []
        for dy in range(3):
            for dx in range(3):
                a = G + (dy - 1) * Wp + (dx - 1)
                windows.append(xv[:, a:a + Lb])
        patches = jnp.concatenate(windows, axis=0).astype(jnp.bfloat16)  # (9*cin, Lb)

        # One wide-K MXU matmul per layer, bf16 operands, fp32 accumulation.
        acc = jnp.dot(w, patches, preferred_element_type=jnp.float32)   # (cout, Lb)
        act = jnp.maximum(acc + b, 0.0) * mask     # bias + ReLU, re-zero the halo

        if l == depth - 1:
            o_ref[...] = act.astype(o_ref.dtype)
        else:
            act_ref[0:cout, G:G + Lb] = act        # stays in VMEM for next layer


def _round_up(x, m):
    return ((x + m - 1) // m) * m


def _pick_batch_block(n, hp_wp, target_lanes=4096):
    """Largest legal batch chunk: the lane block must be the full lane extent or a
    multiple of 128; stop growing once a chunk reaches ~target_lanes lanes."""
    best = n
    for nb in range(1, n + 1):
        if n % nb:
            continue
        if nb != n and (nb * hp_wp) % 128 != 0:
            continue
        best = nb
        if nb * hp_wp >= target_lanes:
            break
    return best


@jax.jit
def conv_model_forward_nchw(x_nchw, params):
    """Forward pass of conv_model (batch_norm=False). NCHW in / NCHW out.

    params: list of (weight (Cout, Cin, 3, 3) f32, bias (Cout,) f32) per layer,
            i.e. the PyTorch Conv2d parameter layout.
    """
    N, Cin0, H, W = x_nchw.shape
    Hp, Wp = H + 2, W + 2

    channel_plan = [Cin0] + [int(w.shape[0]) for w, _ in params]
    c_max = max(channel_plan)

    nb = _pick_batch_block(N, Hp * Wp)
    Lb = nb * Hp * Wp
    L = N * Hp * Wp
    G = _round_up(Wp + 1, 128)      # guard >= Wp+1 zeros; lane-aligned interior

    # One-time lane-dense re-layout at the HBM boundary:
    # NCHW -> zero-pad spatial once -> (C, N*(H+2)*(W+2)), spatial on lanes.
    x_pad = jnp.pad(x_nchw, ((0, 0), (0, 0), (1, 1), (1, 1)))
    x_flat = jnp.transpose(x_pad, (1, 0, 2, 3)).reshape(Cin0, L)

    # Interior mask: 1 at real pixels, 0 at per-image halo.  Re-zeroes the
    # padding after each fused layer (no per-layer jnp.pad / HBM round trip).
    pos = jnp.arange(Hp * Wp)
    r, c = pos // Wp, pos % Wp
    m = ((r >= 1) & (r <= H) & (c >= 1) & (c <= W)).astype(jnp.float32)
    mask = jnp.tile(m, nb).reshape(1, Lb)

    # Pack weights for the kernel: (Cout, Cin, 3, 3) -> (Cout, 9*Cin) with K
    # ordered (dy, dx, cin); bf16 MXU operands.  Bias -> (Cout, 1) fp32.
    flat_params = []
    in_specs = [
        pl.BlockSpec((Cin0, Lb), lambda i: (0, i)),
        pl.BlockSpec((1, Lb), lambda i: (0, 0)),
    ]
    for w, b in params:
        cout, cin = int(w.shape[0]), int(w.shape[1])
        w_mat = jnp.transpose(w, (0, 2, 3, 1)).reshape(cout, 9 * cin)
        w_mat = w_mat.astype(jnp.bfloat16)
        b2 = b.reshape(cout, 1).astype(jnp.float32)
        flat_params += [w_mat, b2]
        in_specs += [pl.BlockSpec((cout, 9 * cin), lambda i: (0, 0)),
                     pl.BlockSpec((cout, 1), lambda i: (0, 0))]

    cout_last = channel_plan[-1]
    kernel = functools.partial(
        _fused_conv_model_kernel, tuple(channel_plan), H, W, nb, G)

    out = pl.pallas_call(
        kernel,
        out_shape=jax.ShapeDtypeStruct((cout_last, L), jnp.float32),
        grid_spec=pltpu.PrefetchScalarGridSpec(
            num_scalar_prefetch=0,
            grid=(N // nb,),
            in_specs=in_specs,
            out_specs=pl.BlockSpec((cout_last, Lb), lambda i: (0, i)),
            scratch_shapes=[pltpu.VMEM((c_max, G + Lb + G), jnp.float32)],
        ),
        compiler_params=pltpu.CompilerParams(
            dimension_semantics=("parallel",)),
    )(x_flat, mask, *flat_params)

    # Crop the halo and return in PyTorch NCHW convention.
    out = out.reshape(cout_last, N, Hp, Wp)[:, :, 1:H + 1, 1:W + 1]
    return jnp.transpose(out, (1, 0, 2, 3))


def init_conv_model_params(key, in_channels, out_channels, depth):
    """Matches conv_model._initialize_weights: kaiming_normal_(fan_out, relu), bias=0.
    Returns PyTorch-layout params: [(w (Cout, Cin, 3, 3) f32, b (Cout,) f32), ...]."""
    params = []
    in_c = in_channels
    for i in range(depth):
        out_c = out_channels if i >= depth // 2 else in_c
        key, sub = jax.random.split(key)
        fan_out = out_c * 3 * 3
        std = math.sqrt(2.0 / fan_out)
        w = std * jax.random.normal(sub, (out_c, in_c, 3, 3), dtype=jnp.float32)
        b = jnp.zeros((out_c,), dtype=jnp.float32)
        params.append((w, b))
        in_c = out_c
    return params


def _reference_forward(x_nchw, params):
    """Plain-XLA reference: Conv2d(3x3, pad=1, bias) + ReLU per layer."""
    y = x_nchw
    for w, b in params:
        y = jax.lax.conv_general_dilated(
            y, w, window_strides=(1, 1), padding=((1, 1), (1, 1)),
            dimension_numbers=("NCHW", "OIHW", "NCHW"))
        y = jnp.maximum(y + b.reshape(1, -1, 1, 1), 0.0)
    return y


if __name__ == "__main__":
    # Small shapes consistent with the module:
    # batch=2, in_channels=4, out_channels=8, spatial=16x16, depth=2
    in_channels, out_channels, depth = 4, 8, 2

    key = jax.random.PRNGKey(0)
    key, xkey = jax.random.split(key)
    x = jax.random.normal(xkey, (2, in_channels, 16, 16), dtype=jnp.float32)

    params = init_conv_model_params(key, in_channels, out_channels, depth)

    y = conv_model_forward_nchw(x, params)
    y = jax.block_until_ready(y)

    assert y.shape == (2, out_channels, 16, 16), y.shape
    assert bool(jnp.all(y >= 0.0))            # ReLU output

    # Numerical check vs the XLA conv reference (bf16 operands => loose tol).
    y_ref = _reference_forward(x, params)
    max_err = float(jnp.max(jnp.abs(y - y_ref)))
    assert max_err < 0.2, max_err

    print("KERNEL_OK")
</pallas_src>

<mosaic_0001>
module attributes {stable_mosaic.version = 11 : i64} {
  func.func @_fused_conv_model_kernel(%arg0: i32, %arg1: memref<4x648xf32, #tpu.memory_space<vmem>>, %arg2: memref<1x648xf32, #tpu.memory_space<vmem>>, %arg3: memref<4x36xbf16, #tpu.memory_space<vmem>>, %arg4: memref<4x1xf32, #tpu.memory_space<vmem>>, %arg5: memref<8x36xbf16, #tpu.memory_space<vmem>>, %arg6: memref<8x1xf32, #tpu.memory_space<vmem>>, %arg7: memref<8x648xf32, #tpu.memory_space<vmem>>, %arg8: memref<8x904xf32, #tpu.memory_space<vmem>>) attributes {dimension_semantics = [#tpu.dimension_semantics<parallel>], iteration_bounds = array<i64: 1>, scalar_prefetch = 0 : i64, scratch_operands = 1 : i64, tpu.core_type = #tpu.core_type<tc>, window_params = [{transform_indices = @transform_0, window_bounds = array<i64: 4, 648>}, {pipeline_mode = #tpu.pipeline_mode<synchronous>, transform_indices = @transform_1, window_bounds = array<i64: 1, 648>}, {pipeline_mode = #tpu.pipeline_mode<synchronous>, transform_indices = @transform_2, window_bounds = array<i64: 4, 36>}, {pipeline_mode = #tpu.pipeline_mode<synchronous>, transform_indices = @transform_3, window_bounds = array<i64: 4, 1>}, {pipeline_mode = #tpu.pipeline_mode<synchronous>, transform_indices = @transform_4, window_bounds = array<i64: 8, 36>}, {pipeline_mode = #tpu.pipeline_mode<synchronous>, transform_indices = @transform_5, window_bounds = array<i64: 8, 1>}, {transform_indices = @transform_6, window_bounds = array<i64: 8, 648>}]} {
    %cst = arith.constant 0.000000e+00 : f32
    %0 = vector.broadcast %cst : f32 to vector<8x904xf32>
    %c0 = arith.constant 0 : index
    %c0_0 = arith.constant 0 : index
    %1 = vector.load %arg8[%c0, %c0_0] : memref<8x904xf32, #tpu.memory_space<vmem>>, vector<8x904xf32>
    tpu.vector_store %arg8[%c0, %c0_0], %0 {strides = array<i32>} : memref<8x904xf32, #tpu.memory_space<vmem>>, vector<8x904xf32>,
    %c0_1 = arith.constant 0 : index
    %c0_2 = arith.constant 0 : index
    %2 = vector.load %arg1[%c0_1, %c0_2] : memref<4x648xf32, #tpu.memory_space<vmem>>, vector<4x648xf32>
    %c0_3 = arith.constant 0 : index
    %c128 = arith.constant 128 : index
    %3 = vector.load %arg8[%c0_3, %c128] : memref<8x904xf32, #tpu.memory_space<vmem>>, vector<4x648xf32>
    tpu.vector_store %arg8[%c0_3, %c128], %2 {strides = array<i32>} : memref<8x904xf32, #tpu.memory_space<vmem>>, vector<4x648xf32>,
    %c0_4 = arith.constant 0 : index
    %c0_5 = arith.constant 0 : index
    %4 = vector.load %arg2[%c0_4, %c0_5] : memref<1x648xf32, #tpu.memory_space<vmem>>, vector<1x648xf32>
    %c0_6 = arith.constant 0 : index
    %c0_7 = arith.constant 0 : index
    %5 = vector.load %arg3[%c0_6, %c0_7] : memref<4x36xbf16, #tpu.memory_space<vmem>>, vector<4x36xbf16>
    %c0_8 = arith.constant 0 : index
    %c0_9 = arith.constant 0 : index
    %6 = vector.load %arg4[%c0_8, %c0_9] : memref<4x1xf32, #tpu.memory_space<vmem>>, vector<4x1xf32>
    %c0_10 = arith.constant 0 : index
    %c0_11 = arith.constant 0 : index
    %7 = vector.load %arg8[%c0_10, %c0_11] : memref<8x904xf32, #tpu.memory_space<vmem>>, vector<4x904xf32>
    %8 = vector.extract_strided_slice %7 {offsets = [0, 109], sizes = [4, 648], strides = [1, 1]} : vector<4x904xf32> to vector<4x648xf32>
    %9 = vector.extract_strided_slice %7 {offsets = [0, 110], sizes = [4, 648], strides = [1, 1]} : vector<4x904xf32> to vector<4x648xf32>
    %10 = vector.extract_strided_slice %7 {offsets = [0, 111], sizes = [4, 648], strides = [1, 1]} : vector<4x904xf32> to vector<4x648xf32>
    %11 = vector.extract_strided_slice %7 {offsets = [0, 127], sizes = [4, 648], strides = [1, 1]} : vector<4x904xf32> to vector<4x648xf32>
    %12 = vector.extract_strided_slice %7 {offsets = [0, 128], sizes = [4, 648], strides = [1, 1]} : vector<4x904xf32> to vector<4x648xf32>
    %13 = vector.extract_strided_slice %7 {offsets = [0, 129], sizes = [4, 648], strides = [1, 1]} : vector<4x904xf32> to vector<4x648xf32>
    %14 = vector.extract_strided_slice %7 {offsets = [0, 145], sizes = [4, 648], strides = [1, 1]} : vector<4x904xf32> to vector<4x648xf32>
    %15 = vector.extract_strided_slice %7 {offsets = [0, 146], sizes = [4, 648], strides = [1, 1]} : vector<4x904xf32> to vector<4x648xf32>
    %16 = vector.extract_strided_slice %7 {offsets = [0, 147], sizes = [4, 648], strides = [1, 1]} : vector<4x904xf32> to vector<4x648xf32>
    %17 = tpu.concatenate %8, %9, %10, %11, %12, %13, %14, %15, %16 in 0 : vector<4x648xf32>, vector<4x648xf32>, vector<4x648xf32>, vector<4x648xf32>, vector<4x648xf32>, vector<4x648xf32>, vector<4x648xf32>, vector<4x648xf32>, vector<4x648xf32> -> vector<36x648xf32>
    %18 = arith.truncf %17 : vector<36x648xf32> to vector<36x648xbf16>
    %cst_12 = arith.constant dense<0.000000e+00> : vector<4x648xf32>
    %19 = tpu.matmul %5, %18, %cst_12 {dimension_numbers = #tpu.dot_dimension_numbers<[1], [0], [0], [1], [0, 0, 1, 1], [], []>} : vector<4x36xbf16>, vector<36x648xbf16>, vector<4x648xf32> -> vector<4x648xf32>
    %20 = vector.broadcast %6 : vector<4x1xf32> to vector<4x648xf32>
    %21 = arith.addf %19, %20 : vector<4x648xf32>
    %cst_13 = arith.constant 0.000000e+00 : f32
    %22 = vector.broadcast %cst_13 : f32 to vector<4x648xf32>
    %23 = arith.maximumf %21, %22 : vector<4x648xf32>
    %24 = vector.broadcast %4 : vector<1x648xf32> to vector<4x648xf32>
    %25 = arith.mulf %23, %24 : vector<4x648xf32>
    %c0_14 = arith.constant 0 : index
    %c128_15 = arith.constant 128 : index
    %26 = vector.load %arg8[%c0_14, %c128_15] : memref<8x904xf32, #tpu.memory_space<vmem>>, vector<4x648xf32>
    tpu.vector_store %arg8[%c0_14, %c128_15], %25 {strides = array<i32>} : memref<8x904xf32, #tpu.memory_space<vmem>>, vector<4x648xf32>,
    %c0_16 = arith.constant 0 : index
    %c0_17 = arith.constant 0 : index
    %27 = vector.load %arg5[%c0_16, %c0_17] : memref<8x36xbf16, #tpu.memory_space<vmem>>, vector<8x36xbf16>
    %c0_18 = arith.constant 0 : index
    %c0_19 = arith.constant 0 : index
    %28 = vector.load %arg6[%c0_18, %c0_19] : memref<8x1xf32, #tpu.memory_space<vmem>>, vector<8x1xf32>
    %c0_20 = arith.constant 0 : index
    %c0_21 = arith.constant 0 : index
    %29 = vector.load %arg8[%c0_20, %c0_21] : memref<8x904xf32, #tpu.memory_space<vmem>>, vector<4x904xf32>
    %30 = vector.extract_strided_slice %29 {offsets = [0, 109], sizes = [4, 648], strides = [1, 1]} : vector<4x904xf32> to vector<4x648xf32>
    %31 = vector.extract_strided_slice %29 {offsets = [0, 110], sizes = [4, 648], strides = [1, 1]} : vector<4x904xf32> to vector<4x648xf32>
    %32 = vector.extract_strided_slice %29 {offsets = [0, 111], sizes = [4, 648], strides = [1, 1]} : vector<4x904xf32> to vector<4x648xf32>
    %33 = vector.extract_strided_slice %29 {offsets = [0, 127], sizes = [4, 648], strides = [1, 1]} : vector<4x904xf32> to vector<4x648xf32>
    %34 = vector.extract_strided_slice %29 {offsets = [0, 128], sizes = [4, 648], strides = [1, 1]} : vector<4x904xf32> to vector<4x648xf32>
    %35 = vector.extract_strided_slice %29 {offsets = [0, 129], sizes = [4, 648], strides = [1, 1]} : vector<4x904xf32> to vector<4x648xf32>
    %36 = vector.extract_strided_slice %29 {offsets = [0, 145], sizes = [4, 648], strides = [1, 1]} : vector<4x904xf32> to vector<4x648xf32>
    %37 = vector.extract_strided_slice %29 {offsets = [0, 146], sizes = [4, 648], strides = [1, 1]} : vector<4x904xf32> to vector<4x648xf32>
    %38 = vector.extract_strided_slice %29 {offsets = [0, 147], sizes = [4, 648], strides = [1, 1]} : vector<4x904xf32> to vector<4x648xf32>
    %39 = tpu.concatenate %30, %31, %32, %33, %34, %35, %36, %37, %38 in 0 : vector<4x648xf32>, vector<4x648xf32>, vector<4x648xf32>, vector<4x648xf32>, vector<4x648xf32>, vector<4x648xf32>, vector<4x648xf32>, vector<4x648xf32>, vector<4x648xf32> -> vector<36x648xf32>
    %40 = arith.truncf %39 : vector<36x648xf32> to vector<36x648xbf16>
    %cst_22 = arith.constant dense<0.000000e+00> : vector<8x648xf32>
    %41 = tpu.matmul %27, %40, %cst_22 {dimension_numbers = #tpu.dot_dimension_numbers<[1], [0], [0], [1], [0, 0, 1, 1], [], []>} : vector<8x36xbf16>, vector<36x648xbf16>, vector<8x648xf32> -> vector<8x648xf32>
    %42 = vector.broadcast %28 : vector<8x1xf32> to vector<8x648xf32>
    %43 = arith.addf %41, %42 : vector<8x648xf32>
    %cst_23 = arith.constant 0.000000e+00 : f32
    %44 = vector.broadcast %cst_23 : f32 to vector<8x648xf32>
    %45 = arith.maximumf %43, %44 : vector<8x648xf32>
    %46 = vector.broadcast %4 : vector<1x648xf32> to vector<8x648xf32>
    %47 = arith.mulf %45, %46 : vector<8x648xf32>
    %c0_24 = arith.constant 0 : index
    %c0_25 = arith.constant 0 : index
    %48 = vector.load %arg7[%c0_24, %c0_25] : memref<8x648xf32, #tpu.memory_space<vmem>>, vector<8x648xf32>
    tpu.vector_store %arg7[%c0_24, %c0_25], %47 {strides = array<i32>} : memref<8x648xf32, #tpu.memory_space<vmem>>, vector<8x648xf32>,
    return
  }
  func.func @transform_0(%arg0: i32) -> (i32, i32) {
    %c0_i32 = arith.constant 0 : i32
    %c0_i32_0 = arith.constant 0 : i32
    return %c0_i32, %arg0 : i32, i32
  }
  func.func @transform_1(%arg0: i32) -> (i32, i32) {
    %c0_i32 = arith.constant 0 : i32
    %c0_i32_0 = arith.constant 0 : i32
    %c0_i32_1 = arith.constant 0 : i32
    return %c0_i32, %c0_i32_0 : i32, i32
  }
  func.func @transform_2(%arg0: i32) -> (i32, i32) {
    %c0_i32 = arith.constant 0 : i32
    %c0_i32_0 = arith.constant 0 : i32
    %c0_i32_1 = arith.constant 0 : i32
    return %c0_i32, %c0_i32_0 : i32, i32
  }
  func.func @transform_3(%arg0: i32) -> (i32, i32) {
    %c0_i32 = arith.constant 0 : i32
    %c0_i32_0 = arith.constant 0 : i32
    %c0_i32_1 = arith.constant 0 : i32
    return %c0_i32, %c0_i32_0 : i32, i32
  }
  func.func @transform_4(%arg0: i32) -> (i32, i32) {
    %c0_i32 = arith.constant 0 : i32
    %c0_i32_0 = arith.constant 0 : i32
    %c0_i32_1 = arith.constant 0 : i32
    return %c0_i32, %c0_i32_0 : i32, i32
  }
  func.func @transform_5(%arg0: i32) -> (i32, i32) {
    %c0_i32 = arith.constant 0 : i32
    %c0_i32_0 = arith.constant 0 : i32
    %c0_i32_1 = arith.constant 0 : i32
    return %c0_i32, %c0_i32_0 : i32, i32
  }
  func.func @transform_6(%arg0: i32) -> (i32, i32) {
    %c0_i32 = arith.constant 0 : i32
    %c0_i32_0 = arith.constant 0 : i32
    return %c0_i32, %arg0 : i32, i32
  }
}

</mosaic_0001>

<bundles_post_ra>
// kernel: tile.8
= control target key start
LH: loop header
LB: loop body
LE: loop exit
PB: predicated region body
PF: predicated region fallthrough
CT: control target
= control target key end

     0   :  { %s46_s0 = inlined_call_operand.vmem [shape: f32[324], index: 0, kind: input, shape index: {}]   ;;  %s47_s1 = inlined_call_operand.vmem [shape: f32[2,324], index: 1, kind: output, shape index: {}]  }
   0x1   :  { %v4_v0 = vld [vmem:[%s46_s0] ss:$0 sm:$0xff]  ;;  %v14_v1 = vld [vmem:[%s46_s0 + $0x1] ss:$0 sm:$0xff]  ;;  %v16_v2 = vld [vmem:[%s46_s0 + $0x2] ss:$0 sm:$0xff] }
   0x2   :  { %5 = vst [vmem:[%s47_s1] sm:$0x3] %v4_v0  ;;  %15 = vst [vmem:[%s47_s1 + $0x2] sm:$0x3] %v14_v1 }
   0x3   :  { %17 = vst [vmem:[%s47_s1 + $0x4] sm:$0x3] %v16_v2 }

// kernel: tile.9
= control target key start
LH: loop header
LB: loop body
LE: loop exit
PB: predicated region body
PF: predicated region fallthrough
CT: control target
= control target key end

     0   :  { %vm30_vm0 = vcmask 1042434   ;;  %s20_s12 = smov 3  ;;  %vm32_vm1 = vcmask 490496   ;;  %vm17_vm2 = vcmask 556032   ;;  %s45_s13 = smov 3  ;;  %vm36_vm3 = vcmask 64512   ;;  %s140_s0 = inlined_call_operand.vmem [shape: f32[2,324], index: 0, kind: input, shape index: {}]   ;;  %s141_s1 = inlined_call_operand.vmem [shape: f32[1,648], index: 1, kind: output, shape index: {}]  }
   0x1   :  { %v92_v0 = vld [vmem:[%s140_s0 + $0x4] sm:$0x3]  ;;  %v93_v1 = vld [vmem:[%s140_s0 + $0x2] sm:$0x3]  ;;  %v13_v2 = vld [vmem:[%s140_s0] sm:$0x3] }
   0x2   :  { %8 = vst [vmem:[#allocation1 + $0x10] sm:$0x3] %v92_v0  ;;  %12 = vst [vmem:[#allocation1 + $0x8] sm:$0x3] %v93_v1  ;;  %s26_s0 = smov 3  ;;  %s100_s14 = smov 68  }
   0x3   :  { %14 = vst [vmem:[#allocation1] sm:$0x3] %v13_v2  ;;  %vm39_vm4 = vcmask 1048096  }
   0x9   :  { %v24_v3 = vld [vmem:[#allocation1 + $0x11] sm:$0x1]   ;;  %v29_v5 = vld [vmem:[#allocation1 + $0x7] sm:$0x4]   ;;  %v16_v8 = vld [vmem:[#allocation1 + $0x10] sm:$0x1]  }
   0xa   :  { %v27_v4 = vld [vmem:[#allocation1 + $0x11] ss:$-16 sm:%s26_s0]   ;;  %v21_v7 = vld [vmem:[#allocation1] ss:$8 sm:%s20_s12]   ;;  %19 = vst.msk [vmem:[#allocation0 + $0x10] sm:$0x1] %vm17_vm2, %v16_v8  }
   0xb   :  { %v31_v6 = vsel %vm30_vm0, %v29_v5, %v27_v4  ;;  %22 = vst [vmem:[#allocation0] ss:$8 sm:$0x3] %v21_v7   ;;  %v46_v10 = vld [vmem:[#allocation1 + $0x9] ss:$-8 sm:%s45_s13]  }
   0xc   :  { %v33_v9 = vsel %vm32_vm1, %v31_v6, %v24_v3 }
   0xd   :  { %34 = vrot.lane.b32.xlu0 %v33_v9, %s100_s14 }
  0x11   :  { %47 = vrot.lane.b32.xlu0 %v46_v10, %s100_s14 }
  0x12   :  { %v55_v11 = vld [vmem:[#allocation0] sm:$0x1]  ;;  %v59_v12 = vld [vmem:[#allocation0 + $0x8] sm:$0x1] }
  0x13   :  { %57 = vst [vmem:[%s141_s1] sm:$0x1] %v55_v11  ;;  %94 = vst [vmem:[%s141_s1 + $0x1] sm:$0x1] %v59_v12 }
  0x7f   :  { %v35_v13 = vpop.permute.xlu0 %34  }
  0x80   :  { %38 = vst.msk [vmem:[#allocation0 + $0x28] sm:$0x1] %vm36_vm3, %v35_v13  }
  0x81   :  { %41 = vst.msk [vmem:[#allocation0 + $0x20] ss:$-16 sm:$0x3] %vm39_vm4, %v35_v13   ;;  %43 = vst.msk [vmem:[#allocation0 + $0x16] sm:$0x4] %vm39_vm4, %v35_v13  }
  0x83   :  { %v48_v14 = vpop.permute.xlu0 %47  }
  0x84   :  { %51 = vst.msk [vmem:[#allocation0 + $0x20] ss:$-8 sm:$0x3] %vm17_vm2, %v48_v14  }
  0x87   :  { %v82_v16 = vld [vmem:[#allocation0 + $0x28] sm:$0x1] }
  0x88   :  { %v64_v15 = vld [vmem:[#allocation0 + $0x10] sm:$0x1]  ;;  %98 = vst [vmem:[%s141_s1 + $0x5] sm:$0x1] %v82_v16 }
  0x89   :  { %95 = vst [vmem:[%s141_s1 + $0x2] sm:$0x1] %v64_v15 }
  0x8b   :  { %v70_v17 = vld [vmem:[#allocation0 + $0x18] sm:$0x1]  ;;  %v76_v18 = vld [vmem:[#allocation0 + $0x20] sm:$0x1] }
  0x8c   :  { %96 = vst [vmem:[%s141_s1 + $0x3] sm:$0x1] %v70_v17  ;;  %97 = vst [vmem:[%s141_s1 + $0x4] sm:$0x1] %v76_v18 }

// kernel: conv_model_forward_nchw.1
= control target key start
LH: loop header
LB: loop body
LE: loop exit
PB: predicated region body
PF: predicated region fallthrough
CT: control target
= control target key end

     0   :  { %v1338_v0 = vmov 0.0   ;;  %vm50_vm0 = vcmask 60416   ;;  %s1340_s27 = smov 127   ;;  %s1341_s28 = smov 110   ;;  %vm271_vm1 = vcmask 1043456   ;;  %vm138_vm2 = vcmask 900096   ;;  %s2022_s0 = inlined_call_operand.vmem [shape: f32[4,648], index: 0, kind: input, shape index: {}]   ;;  %s2023_s3 = inlined_call_operand.vmem [shape: f32[4,1], index: 3, kind: input, shape index: {}]   ;;  %s2024_s2 = inlined_call_operand.vmem [shape: bf16[4,36], index: 2, kind: input, shape index: {}]   ;;  %s2025_s1 = inlined_call_operand.vmem [shape: f32[1,648], index: 1, kind: input, shape index: {}]   ;;  %s2026_s5 = inlined_call_operand.vmem [shape: f32[8,1], index: 5, kind: input, shape index: {}]   ;;  %s2027_s4 = inlined_call_operand.vmem [shape: bf16[8,36], index: 4, kind: input, shape index: {}]   ;;  %s2028_s6 = inlined_call_operand.vmem [shape: f32[8,648], index: 6, kind: output, shape index: {}]  }
   0x1   :  { %24 = vst [vmem:[#allocation2] sm:$0xff] %v1338_v0  ;;  %27 = vst [vmem:[#allocation2 + $0x18] sm:$0xff] %v1338_v0  ;;  %v34_v1 = vld [vmem:[%s2022_s0 + $0x8] sm:$0xff]  ;;  %v33_v2 = vld [vmem:[%s2022_s0] sm:$0xff]  ;;  %s1342_s29 = smov 109   ;;  %s1343_s30 = smov 108  }
   0x2   :  { %25 = vst [vmem:[#allocation2 + $0x8] sm:$0xff] %v1338_v0  ;;  %26 = vst [vmem:[#allocation2 + $0x10] sm:$0xff] %v1338_v0  ;;  %v35_v3 = vld [vmem:[%s2022_s0 + $0x10] sm:$0xff]  ;;  %v40_v4 = vcombine.high %v34_v1, %v34_v1  ;;  %v39_v5 = vcombine.high %v33_v2, %v33_v2  ;;  %s1339_s0 = smov 126   ;;  %s1344_s7 = smov 92   ;;  %vm110_vm3 = vcmask 1031168  }
   0x3   :  { %28 = vst [vmem:[#allocation2 + $0x20] sm:$0xff] %v1338_v0  ;;  %29 = vst [vmem:[#allocation2 + $0x28] sm:$0xff] %v1338_v0  ;;  %v41_v6 = vcombine.high %v35_v3, %v35_v3  ;;  %s1345_s8 = smov 91   ;;  %s1346_s9 = smov 90   ;;  %vm86_vm4 = vcmask 1039360   ;;  %vm259_vm5 = vcmask 736256  }
   0x4   :  { %30 = vst [vmem:[#allocation2 + $0x30] sm:$0xff] %v1338_v0  ;;  %47 = vst [vmem:[#allocation2 + $0x18] sm:$0xf] %v34_v1  ;;  %s1347_s10 = smov 19   ;;  %vm163_vm6 = vcmask 891904   ;;  %vm187_vm7 = vcmask 883712  }
   0x5   :  { %45 = vst [vmem:[#allocation2 + $0x8] sm:$0xf] %v33_v2  ;;  %49 = vst [vmem:[#allocation2 + $0x28] sm:$0xf] %v35_v3  ;;  %vm211_vm8 = vcmask 752640   ;;  %vm235_vm9 = vcmask 744448  }
   0x6   :  { %48 = vst [vmem:[#allocation2 + $0x20] sm:$0xf] %v40_v4  ;;  %46 = vst [vmem:[#allocation2 + $0x10] sm:$0xf] %v39_v5  ;;  %vm373_vm10 = vcmask 154624   ;;  %vm405_vm11 = vcmask 1041408  }
   0x7   :  { %51 = vst.msk [vmem:[#allocation2 + $0x30] sm:$0xf] %vm50_vm0, %v41_v6  ;;  %vm401_vm12 = vcmask 293888   ;;  %vm31_vm13 = vcmask 64512  }
   0x8   :  { %v1394_v7 = vld [vmem:[#allocation2] sm:$0xf] }
   0x9   :  { %v68_v9 = vrot.slane %v1394_v7, 4 }
   0xb   :  { %v1396_v8 = vld [vmem:[#allocation2 + $0x18] sm:$0xf] }
   0xc   :  { %v1399_v10 = vld [vmem:[#allocation2 + $0x8] sm:$0xf]  ;;  %v1123_v11 = vpack.i.bf16 %v1394_v7, %v1396_v8  ;;  %v71_v12 = vrot.slane %v1396_v8, 4 }
   0xd   :  { %v69_v13 = vrot.slane %v1399_v10, 4  ;;  %v1405_v14 = vld [vmem:[#allocation2 + $0x10] sm:$0xf]  ;;  %v1412_v19 = vld [vmem:[#allocation2 + $0x20] sm:$0xf] }
   0xe   :  { %1124 = vrot.lane.b32.xlu1 %v1123_v11, %s1339_s0  ;;  %v1128_v15 = vpack.i.bf16 %v68_v9, %v71_v12  ;;  %v1133_v16 = vpack.i.bf16 %v1405_v14, %v1399_v10  ;;  %v70_v17 = vrot.slane %v1405_v14, 4  ;;  %v1414_v20 = vld [vmem:[#allocation2 + $0x28] sm:$0xf]  ;;  %v72_v21 = vrot.slane %v1412_v19, 4  ;;  %v61_v27 = vld [vmem:[#allocation2 + $0x30] sm:$0xf] }
   0xf   :  { %v73_v22 = vrot.slane %v1414_v20, 4  ;;  %v1143_v23 = vpack.i.bf16 %v1414_v20, %v1412_v19  ;;  %v1173_v25 = vpack.i.bf16 %v1412_v19, %v1396_v8  ;;  %v123_v28 = vrot.slane %v61_v27, 4 }
  0x10   :  { %1129 = vrot.lane.b32.xlu0 %v1128_v15, %s1340_s27  ;;  %v1148_v18 = vpack.i.bf16 %v70_v17, %v69_v13  ;;  %v1183_v26 = vpack.i.bf16 %v72_v21, %v71_v12 }
  0x11   :  { %v1158_v24 = vpack.i.bf16 %v73_v22, %v72_v21 }
  0x12   :  { %1134 = vrot.lane.b32.xlu1 %v1133_v16, %s1339_s0 }
  0x14   :  { %1149 = vrot.lane.b32.xlu0 %v1148_v18, %s1340_s27 }
  0x16   :  { %1139 = vrot.lane.b32.xlu1 %v1128_v15, %s1341_s28 }
  0x18   :  { %1154 = vrot.lane.b32.xlu0 %v1148_v18, %s1341_s28 }
  0x1a   :  { %1144 = vrot.lane.b32.xlu1 %v1143_v23, %s1339_s0 }
  0x1c   :  { %1159 = vrot.lane.b32.xlu0 %v1158_v24, %s1340_s27 }
  0x1e   :  { %1169 = vrot.lane.b32.xlu1 %v1133_v16, %s1342_s29 }
  0x20   :  { %1164 = vrot.lane.b32.xlu0 %v1158_v24, %s1341_s28 }
  0x22   :  { %1179 = vrot.lane.b32.xlu1 %v1148_v18, %s1343_s30 }
  0x24   :  { %1174 = vrot.lane.b32.xlu0 %v1173_v25, %s1342_s29 }
  0x26   :  { %1189 = vrot.lane.b32.xlu1 %v1133_v16, %s1344_s7 }
  0x28   :  { %1184 = vrot.lane.b32.xlu0 %v1183_v26, %s1343_s30 }
  0x2a   :  { %1199 = vrot.lane.b32.xlu1 %v1148_v18, %s1345_s8 }
  0x2c   :  { %1194 = vrot.lane.b32.xlu0 %v1173_v25, %s1344_s7 }
  0x2e   :  { %159 = vrot.lane.b32.xlu1 %v1414_v20, %s1342_s29 }
  0x30   :  { %1204 = vrot.lane.b32.xlu0 %v1183_v26, %s1345_s8 }
  0x32   :  { %207 = vrot.lane.b32.xlu1 %v1414_v20, %s1344_s7 }
  0x34   :  { %183 = vrot.lane.b32.xlu0 %v73_v22, %s1343_s30 }
  0x36   :  { %1209 = vrot.lane.b32.xlu1 %v1133_v16, %s1346_s9 }
  0x38   :  { %231 = vrot.lane.b32.xlu0 %v73_v22, %s1345_s8 }
  0x3a   :  { %255 = vrot.lane.b32.xlu1 %v1414_v20, %s1346_s9 }
  0x3c   :  { %1214 = vrot.lane.b32.xlu0 %v1173_v25, %s1346_s9 }
  0x3e   :  { %161 = vrot.lane.b32.xlu1 %v61_v27, %s1342_s29 }
  0x40   :  { %136 = vrot.lane.b32.xlu0 %v123_v28, %s1341_s28 }
  0x42   :  { %209 = vrot.lane.b32.xlu1 %v61_v27, %s1344_s7 }
  0x44   :  { %185 = vrot.lane.b32.xlu0 %v123_v28, %s1343_s30 }
  0x46   :  { %257 = vrot.lane.b32.xlu1 %v61_v27, %s1346_s9 }
  0x48   :  { %233 = vrot.lane.b32.xlu0 %v123_v28, %s1345_s8 }
  0x80   :  { %v1453_v29 = vpop.permute.xlu1 %1124 }
  0x81   :  { %v1126_v57 = vunpack.i.l.bf16 %v1453_v29  ;;  %v1127_v61 = vunpack.i.h.bf16 %v1453_v29 }
  0x82   :  { %v1455_v30 = vpop.permute.xlu0 %1129 }
  0x83   :  { %v1131_v62 = vunpack.i.l.bf16 %v1455_v30  ;;  %v1132_v23 = vunpack.i.h.bf16 %v1455_v30 }
  0x84   :  { %v1457_v31 = vpop.permute.xlu1 %1134 }
  0x85   :  { %v1137_v58 = vunpack.i.h.bf16 %v1457_v31  ;;  %v1136_v0 = vunpack.i.l.bf16 %v1457_v31 }
  0x86   :  { %v1459_v32 = vpop.permute.xlu0 %1149 }
  0x87   :  { %v1152_v59 = vunpack.i.h.bf16 %v1459_v32  ;;  %v113_v4 = vsel %vm110_vm3, %v1137_v58, %v1126_v57  ;;  %v1151_v6 = vunpack.i.l.bf16 %v1459_v32  ;;  %v111_v24 = vsel %vm110_vm3, %v1127_v61, %v1136_v0 }
  0x88   :  { %v1461_v33 = vpop.permute.xlu1 %1139 }
  0x89   :  { %v1141_v55 = vunpack.i.l.bf16 %v1461_v33  ;;  %v89_v5 = vsel %vm86_vm4, %v1152_v59, %v1131_v62  ;;  %v1142_v12 = vunpack.i.h.bf16 %v1461_v33  ;;  %v87_v30 = vsel %vm86_vm4, %v1132_v23, %v1151_v6 }
  0x8a   :  { %v1463_v34 = vpop.permute.xlu0 %1154  ;;  %v274_v29 = vsel %vm271_vm1, %v1405_v14, %v89_v5  ;;  %v112_v14 = vsel %vm110_vm3, %v1136_v0, %v1137_v58  ;;  %v88_v61 = vsel %vm86_vm4, %v1151_v6, %v1152_v59 }
  0x8b   :  { %v1157_v56 = vunpack.i.h.bf16 %v1463_v34  ;;  %v1156_v13 = vunpack.i.l.bf16 %v1463_v34 }
  0x8c   :  { %v1465_v35 = vpop.permute.xlu1 %1144 }
  0x8d   :  { %v141_v1 = vsel %vm138_vm2, %v1157_v56, %v1141_v55  ;;  %v1146_v17 = vunpack.i.l.bf16 %v1465_v35  ;;  %v139_v31 = vsel %vm138_vm2, %v1142_v12, %v1156_v13 }
  0x8e   :  { %v1467_v36 = vpop.permute.xlu0 %1159  ;;  %v280_v22 = vsel %vm271_vm1, %v113_v4, %v141_v1  ;;  %v140_v1 = vsel %vm138_vm2, %v1156_v13, %v1157_v56  ;;  %v1147_v4 = vunpack.i.h.bf16 %v1465_v35 }
  0x8f   :  { %v1161_v18 = vunpack.i.l.bf16 %v1467_v36  ;;  %v298_v33 = vpack.c.bf16 %v280_v22, %v274_v29  ;;  %v114_v34 = vsel %vm110_vm3, %v1126_v57, %v1146_v17  ;;  %v279_v6 = vsel %vm271_vm1, %v112_v14, %v140_v1 }
  0x90   :  { %v1469_v37 = vpop.permute.xlu1 %1169 }
  0x91   :  { %v1171_v43 = vunpack.i.l.bf16 %v1469_v37 }
  0x92   :  { %v1471_v38 = vpop.permute.xlu0 %1164 }
  0x93   :  { %v1166_v9 = vunpack.i.l.bf16 %v1471_v38  ;;  %v1167_v0 = vunpack.i.h.bf16 %v1471_v38 }
  0x94   :  { %v1473_v39 = vpop.permute.xlu1 %1179 }
  0x95   :  { %v1181_v44 = vunpack.i.l.bf16 %v1473_v39  ;;  %v142_v25 = vsel %vm138_vm2, %v1141_v55, %v1166_v9  ;;  %v143_v35 = vsel %vm138_vm2, %v1166_v9, %v1167_v0  ;;  %v115_v9 = vsel %vm110_vm3, %v1146_v17, %v1147_v4 }
  0x96   :  { %v1475_v40 = vpop.permute.xlu0 %1174  ;;  %v281_v57 = vsel %vm271_vm1, %v114_v34, %v142_v25  ;;  %v282_v14 = vsel %vm271_vm1, %v115_v9, %v143_v35 }
  0x97   :  { %v284_v49 = vsel %vm271_vm1, %v1171_v43, %v1181_v44 }
  0x98   :  { %v1477_v41 = vpop.permute.xlu1 %1189 }
  0x99   :  { %v1191_v45 = vunpack.i.l.bf16 %v1477_v41  ;;  %v1192_v26 = vunpack.i.h.bf16 %v1477_v41 }
  0x9a   :  { %v1479_v42 = vpop.permute.xlu0 %1184 }
  0x9b   :  { %v1187_v12 = vunpack.i.h.bf16 %v1479_v42 }
  0x9c   :  { %v1484_v46 = vpop.permute.xlu1 %1199 }
  0x9d   :  { %v1201_v47 = vunpack.i.l.bf16 %v1484_v46  ;;  %v1202_v27 = vunpack.i.h.bf16 %v1484_v46 }
  0x9e   :  { %v1487_v48 = vpop.permute.xlu0 %1194 }
  0x9f   :  { %v290_v50 = vsel %vm271_vm1, %v1191_v45, %v1201_v47  ;;  %v236_v58 = vsel %vm235_vm9, %v1201_v47, %v1202_v27  ;;  %v1196_v34 = vunpack.i.l.bf16 %v1487_v48 }
  0xa0   :  { %v1499_v51 = vpop.permute.xlu1 %159  ;;  %v302_v52 = vpack.c.bf16 %v290_v50, %v284_v49  ;;  %v90_v49 = vsel %vm86_vm4, %v1131_v62, %v1161_v18  ;;  %v1172_v50 = vunpack.i.h.bf16 %v1469_v37  ;;  %v212_v62 = vsel %vm211_vm8, %v1191_v45, %v1192_v26 }
  0xa1   :  { %v275_v56 = vsel %vm271_vm1, %v1396_v8, %v90_v49  ;;  %v291_v5 = vsel %vm271_vm1, %v212_v62, %v236_v58 }
  0xa2   :  { %349 = vrot.lane.b32.xlu1 %v302_v52, %s1347_s10  ;;  %v1502_v53 = vpop.permute.xlu0 %1204  ;;  %v1182_v52 = vunpack.i.h.bf16 %v1473_v39  ;;  %v164_v45 = vsel %vm163_vm6, %v1171_v43, %v1172_v50  ;;  %v299_v8 = vpack.c.bf16 %v281_v57, %v275_v56  ;;  %v1197_v43 = vunpack.i.h.bf16 %v1487_v48 }
  0xa3   :  { %v1207_v38 = vunpack.i.h.bf16 %v1502_v53  ;;  %v1206_v22 = vunpack.i.l.bf16 %v1502_v53  ;;  %v1186_v53 = vunpack.i.l.bf16 %v1479_v42 }
  0xa4   :  { %v1504_v54 = vpop.permute.xlu1 %207  ;;  %v188_v47 = vsel %vm187_vm7, %v1181_v44, %v1182_v52 }
  0xa5   :  { %v215_v23 = vsel %vm211_vm8, %v1197_v43, %v1504_v54  ;;  %v189_v57 = vsel %vm187_vm7, %v1182_v52, %v1186_v53  ;;  %v1348_v52 = vmov 0   ;;  %v190_v37 = vsel %vm187_vm7, %v1186_v53, %v1187_v12 }
  0xa6   :  { %v1511_v60 = vpop.permute.xlu0 %183  ;;  %456 = vmatprep.mubr.bf16.mxu0 %v1348_v52  ;;  %497 = vmatprep.mubr.bf16.mxu1 %v1348_v52 }
  0xa7   :  { %1218 = vset.pattern.permute.xlu0 %v1348_v52 }
  0xa8   :  { %v1210_v63 = vpop.permute.xlu1 %1209 }
  0xa9   :  { %v1212_v2 = vunpack.i.h.bf16 %v1210_v63  ;;  %v1211_v3 = vunpack.i.l.bf16 %v1210_v63 }
  0xaa   :  { %v1521_v11 = vpop.permute.xlu0 %231 }
  0xab   :  { %v308_v15 = vpack.c.bf16 %v1211_v3, %v1211_v3  ;;  %v260_v16 = vsel %vm259_vm5, %v1211_v3, %v1212_v2  ;;  %v278_v3 = vsel %vm271_vm1, %v111_v24, %v139_v31  ;;  %v239_v39 = vsel %vm235_vm9, %v1207_v38, %v1521_v11 }
  0xac   :  { %v309_v21 = vpack.c.bf16 %v260_v16, %v260_v16  ;;  %v1549_v55 = vpop.permute.xlu1 %255  ;;  %v285_v16 = vsel %vm271_vm1, %v164_v45, %v188_v47  ;;  %v191_v24 = vsel %vm187_vm7, %v1187_v12, %v1511_v60  ;;  %v294_v29 = vsel %vm271_vm1, %v215_v23, %v239_v39 }
  0xad   :  { %361 = vrot.lane.b32.xlu0 %v308_v15, %s1347_s10  ;;  %v1177_v15 = vunpack.i.h.bf16 %v1475_v40  ;;  %v303_v25 = vpack.c.bf16 %v291_v5, %v285_v16 }
  0xae   :  { %363 = vrot.lane.b32.xlu1 %v309_v21, %s1347_s10  ;;  %v1536_v28 = vpop.permute.xlu0 %1214  ;;  %v273_v21 = vsel %vm271_vm1, %v1399_v10, %v88_v61  ;;  %v1176_v61 = vunpack.i.l.bf16 %v1475_v40  ;;  %v213_v40 = vsel %vm211_vm8, %v1192_v26, %v1196_v34 }
  0xaf   :  { %v1216_v32 = vunpack.i.l.bf16 %v1536_v28  ;;  %v167_v49 = vsel %vm163_vm6, %v1177_v15, %v1499_v51 }
  0xb0   :  { %v1593_v44 = vpop.permute.xlu1 %161  ;;  %v288_v17 = vsel %vm271_vm1, %v167_v49, %v191_v24 }
  0xb1   :  { %v261_v63 = vsel %vm259_vm5, %v1212_v2, %v1216_v32  ;;  %v272_v2 = vsel %vm271_vm1, %v1394_v7, %v87_v30  ;;  %v1162_v7 = vunpack.i.h.bf16 %v1467_v36  ;;  %v1217_v30 = vunpack.i.h.bf16 %v1536_v28 }
  0xb2   :  { %341 = vrot.lane.b32.xlu1 %v298_v33, %s1347_s10  ;;  %v310_v59 = vpack.c.bf16 %v261_v63, %v261_v63  ;;  %v296_v13 = vpack.c.bf16 %v278_v3, %v272_v2  ;;  %v137_v31 = vpop.permute.xlu0 %136  ;;  %v297_v33 = vpack.c.bf16 %v279_v6, %v273_v21  ;;  %v237_v36 = vsel %vm235_vm9, %v1202_v27, %v1206_v22 }
  0xb3   :  { %v91_v10 = vsel %vm86_vm4, %v1161_v18, %v1162_v7  ;;  %v306_v42 = vpack.c.bf16 %v294_v29, %v288_v17  ;;  %v262_v63 = vsel %vm259_vm5, %v1216_v32, %v1217_v30  ;;  %v144_v46 = vsel %vm138_vm2, %v1167_v0, %v137_v31 }
  0xb4   :  { %365 = vrot.lane.b32.xlu0 %v310_v59, %s1347_s10  ;;  %v210_v18 = vpop.permute.xlu1 %209  ;;  %v276_v48 = vsel %vm271_vm1, %v1412_v19, %v91_v10  ;;  %v292_v62 = vsel %vm271_vm1, %v213_v40, %v237_v36  ;;  %v165_v19 = vsel %vm163_vm6, %v1172_v50, %v1176_v61  ;;  %v238_v28 = vsel %vm235_vm9, %v1206_v22, %v1207_v38 }
  0xb5   :  { %v300_v27 = vpack.c.bf16 %v282_v14, %v276_v48  ;;  %v311_v32 = vpack.c.bf16 %v262_v63, %v262_v63  ;;  %v283_v26 = vsel %vm271_vm1, %v1147_v4, %v144_v46  ;;  %v286_v58 = vsel %vm271_vm1, %v165_v19, %v189_v57  ;;  %v53_v48 = vld [vmem:[%s2024_s2] sm:$0x3] }
  0xb6   :  { %343 = vrot.lane.b32.xlu1 %v299_v8, %s1347_s10  ;;  %v186_v1 = vpop.permute.xlu0 %185  ;;  %v214_v50 = vsel %vm211_vm8, %v1196_v34, %v1197_v43  ;;  %v304_v59 = vpack.c.bf16 %v292_v62, %v286_v58  ;;  %v277_v0 = vsel %vm271_vm1, %v1414_v20, %v1162_v7  ;;  %v166_v3 = vsel %vm163_vm6, %v1176_v61, %v1177_v15 }
  0xb7   :  { %v293_v2 = vsel %vm271_vm1, %v214_v50, %v238_v28  ;;  %v301_v45 = vpack.c.bf16 %v283_v26, %v277_v0  ;;  %v287_v38 = vsel %vm271_vm1, %v166_v3, %v190_v37  ;;  %v263_v20 = vsel %vm259_vm5, %v1217_v30, %v1549_v55  ;;  %v52_v37 = vld [vmem:[%s2025_s1] sm:$0x3f] }
  0xb8   :  { %337 = vrot.lane.b32.xlu0 %v296_v13, %s1347_s10  ;;  %v258_v41 = vpop.permute.xlu1 %257  ;;  %v305_v4 = vpack.c.bf16 %v293_v2, %v287_v38  ;;  %v216_v5 = vsel %vm211_vm8, %v1504_v54, %v210_v18  ;;  %v192_v6 = vsel %vm187_vm7, %v1511_v60, %v186_v1  ;;  %v312_v12 = vpack.c.bf16 %v263_v20, %v263_v20  ;;  %v54_v54 = vld [vmem:[%s2023_s3] sm:$0xf] }
  0xb9   :  { %v264_v56 = vsel %vm259_vm5, %v1549_v55, %v258_v41  ;;  %v168_v55 = vsel %vm163_vm6, %v1499_v51, %v1593_v44 }
  0xba   :  { %351 = vrot.lane.b32.xlu1 %v303_v25, %s1347_s10  ;;  %v234_v47 = vpop.permute.xlu0 %233  ;;  %v313_v8 = vpack.c.bf16 %v264_v56, %v264_v56 }
  0xbb   :  { %v240_v7 = vsel %vm235_vm9, %v1521_v11, %v234_v47  ;;  %v289_v11 = vsel %vm271_vm1, %v168_v55, %v192_v6 }
  0xbc   :  { %339 = vrot.lane.b32.xlu0 %v297_v33, %s1347_s10  ;;  %v295_v43 = vsel %vm271_vm1, %v216_v5, %v240_v7 }
  0xbd   :  { %v307_v39 = vpack.c.bf16 %v295_v43, %v289_v11 }
  0xbe   :  { %357 = vrot.lane.b32.xlu1 %v306_v42, %s1347_s10 }
  0xc0   :  { %345 = vrot.lane.b32.xlu0 %v300_v27, %s1347_s10 }
  0xc2   :  { %367 = vrot.lane.b32.xlu1 %v311_v32, %s1347_s10  ;;  %v554_v32 = vlaneseq }
  0xc4   :  { %353 = vrot.lane.b32.xlu0 %v304_v59, %s1347_s10  ;;  %v555_v41 = vshrl.u32 %v554_v32, 7 }
  0xc6   :  { %347 = vrot.lane.b32.xlu1 %v301_v45, %s1347_s10  ;;  %v556_v26 = vsub.s32 0, %v555_v41  ;;  %v560_v50 = vsub.s32 1, %v555_v41  ;;  %v564_v3 = vsub.s32 2, %v555_v41  ;;  %v568_v38 = vsub.s32 3, %v555_v41 }
  0xc8   :  { %355 = vrot.lane.b32.xlu0 %v305_v4, %s1347_s10  ;;  %v1712_v2 = vrot.slane %v52_v37, %v556_v26  ;;  %v1714_v47 = vrot.slane %v52_v37, %v560_v50 }
  0xca   :  { %371 = vrot.lane.b32.xlu1 %v313_v8, %s1347_s10 }
  0xcc   :  { %369 = vrot.lane.b32.xlu0 %v312_v12, %s1347_s10  ;;  %v1716_v12 = vrot.slane %v52_v37, %v564_v3 }
  0xd0   :  { %359 = vrot.lane.b32.xlu0 %v307_v39, %s1347_s10 }
  0xd4   :  { %316 = vperm.xlu0 %1218, %v54_v54   ;;  %v1720_v54 = vrot.slane %v52_v37, %v568_v38 }
 0x114   :  { %v350_v60 = vpop.permute.xlu1 %349 }
 0x11f   :  { %v362_v35 = vpop.permute.xlu0 %361 }
 0x120   :  { %v364_v13 = vpop.permute.xlu1 %363 }
 0x121   :  { %v384_v34 = vsel %vm373_vm10, %v362_v35, %v364_v13 }
 0x122   :  { %v407_v36 = vsel %vm405_vm11, %v384_v34, 0 }
 0x124   :  { %v342_v15 = vpop.permute.xlu1 %341 }
 0x126   :  { %v366_v16 = vpop.permute.xlu0 %365 }
 0x127   :  { %v385_v49 = vsel %vm373_vm10, %v364_v13, %v366_v16 }
 0x128   :  { %v344_v21 = vpop.permute.xlu1 %343 }
 0x129   :  { %v376_v30 = vsel %vm373_vm10, %v342_v15, %v344_v21 }
 0x12a   :  { %v338_v22 = vpop.permute.xlu0 %337 }
 0x12c   :  { %v352_v51 = vpop.permute.xlu1 %351 }
 0x12d   :  { %v379_v53 = vsel %vm373_vm10, %v350_v60, %v352_v51 }
 0x12e   :  { %v340_v44 = vpop.permute.xlu0 %339 }
 0x12f   :  { %v375_v23 = vsel %vm373_vm10, %v340_v44, %v342_v15  ;;  %v374_v24 = vsel %vm373_vm10, %v338_v22, %v340_v44 }
 0x130   :  { %424 = vmatprep.subr.bf16.mxu0 %v375_v23  ;;  %v358_v25 = vpop.permute.xlu1 %357 }
 0x131   :  { %425 = vmatpush1.bf16.msra.mxu0 %v374_v24 }
 0x132   :  { %v346_v9 = vpop.permute.xlu0 %345 }
 0x133   :  { %v377_v29 = vsel %vm373_vm10, %v344_v21, %v346_v9  ;;  %v572_v21 = vsub.s32 4, %v555_v41 }
 0x134   :  { %465 = vmatprep.subr.bf16.mxu1 %v377_v29  ;;  %v368_v33 = vpop.permute.xlu1 %367 }
 0x135   :  { %466 = vmatpush1.bf16.msra.mxu1 %v376_v30  ;;  %v386_v18 = vsel %vm373_vm10, %v366_v16, %v368_v33  ;;  %v1724_v24 = vrot.slane %v52_v37, %v572_v21 }
 0x136   :  { %v354_v31 = vpop.permute.xlu0 %353  ;;  %v413_v46 = vsel %vm405_vm11, %v386_v18, 0 }
 0x137   :  { %v380_v10 = vsel %vm373_vm10, %v352_v51, %v354_v31  ;;  %v576_v51 = vsub.s32 5, %v555_v41 }
 0x138   :  { %426 = vmatprep.subr.bf16.mxu0 %v380_v10  ;;  %v348_v42 = vpop.permute.xlu1 %347 }
 0x139   :  { %427 = vmatpush1.bf16.msra.mxu0 %v379_v53  ;;  %v378_v40 = vsel %vm373_vm10, %v346_v9, %v348_v42  ;;  %v1726_v29 = vrot.slane %v52_v37, %v576_v51 }
 0x13a   :  { %1100 = vmatprep.subr.msk.bf16.mxu0 %vm405_vm11, %v385_v49  ;;  %v356_v17 = vpop.permute.xlu0 %355 }
 0x13b   :  { %v382_v14 = vsel %vm373_vm10, %v356_v17, %v358_v25  ;;  %v381_v61 = vsel %vm373_vm10, %v354_v31, %v356_v17  ;;  %v1734_v17 = vld [vmem:[#allocation2] sm:$0xf] }
 0x13c   :  { %467 = vmatprep.subr.bf16.mxu1 %v382_v14  ;;  %v372_v27 = vpop.permute.xlu1 %371 }
 0x13d   :  { %429 = vmatpush1.bf16.msra.mxu0 %v407_v36  ;;  %468 = vmatpush1.bf16.msra.mxu1 %v381_v61 }
 0x13e   :  { %506 = vmatprep.subr.bf16.mxu0 %v348_v42  ;;  %v370_v63 = vpop.permute.xlu0 %369 }
 0x13f   :  { %v387_v57 = vsel %vm373_vm10, %v368_v33, %v370_v63  ;;  %v388_v19 = vsel %vm373_vm10, %v370_v63, %v372_v27 }
 0x140   :  { %1101 = vmatmul.mubr.msk.bf16.vlgmr.msra.gmra.mrb[0].mxu0 %vm401_vm12, %v53_v48  ;;  %1102 = vmatprep.subr.msk.bf16.mxu1 %vm405_vm11, %v387_v57  ;;  %v419_v28 = vsel %vm405_vm11, %v388_v19, 0 }
 0x141   :  { %470 = vmatpush1.bf16.msra.mxu1 %v413_v46  ;;  %507 = vmatpush1.bf16.msra.mxu0 %v378_v40  ;;  %v611_v40 = vrot.slane %v1734_v17, 4 }
 0x142   :  { %v360_v1 = vpop.permute.xlu0 %359  ;;  %538 = vmatprep.mubr.bf16.mxu0 %v1348_v52 }
 0x143   :  { %v383_v62 = vsel %vm373_vm10, %v358_v25, %v360_v1  ;;  %508 = vmatprep.subr.bf16.mxu0 %v360_v1 }
 0x144   :  { %1103 = vmatmul.mubr.msk.bf16.vlgmr.msra.gmra.mrb[0].mxu1 %vm401_vm12, %v53_v48 }
 0x145   :  { %509 = vmatpush1.bf16.msra.mxu0 %v383_v62  ;;  %987 = vmatprep.mubr.bf16.mxu1 %v1348_v52 }
 0x146   :  { %1104 = vmatprep.subr.msk.bf16.mxu0 %vm405_vm11, %v372_v27 }
 0x149   :  { %511 = vmatpush1.bf16.msra.mxu0 %v419_v28 }
 0x14c   :  { %1105 = vmatmul.mubr.msk.bf16.vlgmr.msra.gmra.mrb[4].mxu0 %vm401_vm12, %v53_v48 }
 0x14d   :  { %1028 = vmatprep.mubr.bf16.mxu0 %v1348_v52 }
 0x153   :  { %v317_v58 = vpop.permute.xlu0 %316 }
 0x213   :  { %v458_v59 = vpop.f32.mrb[0].mxu0 }
 0x214   :  { %v460_v0 = vpop.f32.mrb[1].mxu0  ;;  %v459_v56 = vadd.f32 %v458_v59, %v317_v58 }
 0x215   :  { %v461_v45 = vadd.f32 %v460_v0, %v317_v58  ;;  %v462_v8 = vpop.f32.mrb[2].mxu0 }
 0x216   :  { %v547_v4 = vmax.f32 %v459_v56, 0.0  ;;  %v463_v20 = vpop.f32.mrb[3].mxu0 }
 0x217   :  { %v548_v7 = vmax.f32 %v461_v45, 0.0  ;;  %v499_v5 = vpop.f32.mrb[0].mxu1 }
 0x218   :  { %v500_v6 = vadd.f32 %v499_v5, %v317_v58  ;;  %v584_v43 = vmul.f32 %v1712_v2, %v547_v4  ;;  %v501_v55 = vpop.f32.mrb[1].mxu1 }
 0x219   :  { %v585_v11 = vmul.f32 %v1714_v47, %v548_v7  ;;  %v502_v39 = vadd.f32 %v501_v55, %v317_v58  ;;  %v503_v60 = vpop.f32.mrb[2].mxu1 }
 0x21a   :  { %v549_v13 = vmax.f32 %v500_v6, 0.0  ;;  %590 = vst [vmem:[#allocation2 + $0x8] sm:$0xf] %v584_v43  ;;  %v504_v35 = vpop.f32.mrb[3].mxu1 }
 0x21b   :  { %591 = vst [vmem:[#allocation2 + $0x10] sm:$0xf] %v585_v11  ;;  %v550_v15 = vmax.f32 %v502_v39, 0.0 }
 0x21c   :  { %v586_v16 = vmul.f32 %v1716_v12, %v549_v13 }
 0x21d   :  { %v587_v22 = vmul.f32 %v1720_v54, %v550_v15 }
 0x21e   :  { %592 = vst [vmem:[#allocation2 + $0x18] sm:$0xf] %v586_v16 }
 0x21f   :  { %593 = vst [vmem:[#allocation2 + $0x20] sm:$0xf] %v587_v22  ;;  %v540_v44 = vpop.f32.mrb[4].mxu0 }
 0x220   :  { %v541_v23 = vadd.f32 %v540_v44, %v317_v58  ;;  %v542_v25 = vpop.f32.mrb[5].mxu0 }
 0x221   :  { %v543_v9 = vadd.f32 %v542_v25, %v317_v58  ;;  %v1728_v30 = vld [vmem:[#allocation2 + $0x8] sm:$0xf]  ;;  %v544_v31 = vpop.f32.mrb[6].mxu0 }
 0x222   :  { %v551_v33 = vmax.f32 %v541_v23, 0.0  ;;  %v1730_v10 = vld [vmem:[#allocation2 + $0x10] sm:$0xf]  ;;  %v545_v53 = vpop.f32.mrb[7].mxu0  ;;  %v612_v63 = vrot.slane %v1728_v30, 4 }
 0x223   :  { %v552_v34 = vmax.f32 %v543_v9, 0.0  ;;  %v1224_v49 = vpack.i.bf16 %v1730_v10, %v1728_v30  ;;  %v613_v57 = vrot.slane %v1730_v10, 4 }
 0x224   :  { %v588_v14 = vmul.f32 %v1724_v24, %v551_v33 }
 0x225   :  { %v589_v61 = vmul.f32 %v1726_v29, %v552_v34  ;;  %1225 = vrot.lane.b32.xlu0 %v1224_v49, %s1339_s0  ;;  %v1739_v36 = vld [vmem:[#allocation2 + $0x18] sm:$0xf]  ;;  %v1269_v27 = vpack.i.bf16 %v613_v57, %v612_v63 }
 0x226   :  { %594 = vst [vmem:[#allocation2 + $0x28] sm:$0xf] %v588_v14  ;;  %v1219_v18 = vpack.i.bf16 %v1734_v17, %v1739_v36  ;;  %v1746_v42 = vld [vmem:[#allocation2 + $0x20] sm:$0xf]  ;;  %v614_v46 = vrot.slane %v1739_v36, 4 }
 0x227   :  { %595 = vst.msk [vmem:[#allocation2 + $0x30] sm:$0xf] %vm50_vm0, %v589_v61  ;;  %v1234_v48 = vpack.i.bf16 %v1746_v42, %v1739_v36  ;;  %v615_v28 = vrot.slane %v1746_v42, 4 }
 0x228   :  { %1220 = vrot.lane.b32.xlu1 %v1219_v18, %s1339_s0  ;;  %v1254_v1 = vpack.i.bf16 %v611_v40, %v614_v46 }
 0x229   :  { %1230 = vrot.lane.b32.xlu0 %v1224_v49, %s1342_s29  ;;  %v1279_v26 = vpack.i.bf16 %v615_v28, %v614_v46 }
 0x22c   :  { %787 = vrot.lane.b32.xlu1 %v1739_v36, %s1346_s9 }
 0x22d   :  { %1240 = vrot.lane.b32.xlu0 %v1224_v49, %s1344_s7  ;;  %v1764_v62 = vld [vmem:[#allocation2 + $0x28] sm:$0xf] }
 0x22e   :  { %v604_v19 = vld [vmem:[#allocation2 + $0x30] sm:$0xf]  ;;  %v616_v41 = vrot.slane %v1764_v62, 4  ;;  %v1294_v37 = vpack.i.bf16 %v1764_v62, %v1746_v42 }
 0x22f   :  { %v1299_v32 = vpack.i.bf16 %v604_v19, %v1764_v62  ;;  %v664_v50 = vrot.slane %v604_v19, 4 }
 0x230   :  { %1235 = vrot.lane.b32.xlu1 %v1234_v48, %s1342_s29  ;;  %v1304_v58 = vpack.i.bf16 %v616_v41, %v615_v28 }
 0x231   :  { %1250 = vrot.lane.b32.xlu0 %v1224_v49, %s1346_s9  ;;  %v1319_v59 = vpack.i.bf16 %v664_v50, %v616_v41 }
 0x234   :  { %1245 = vrot.lane.b32.xlu1 %v1234_v48, %s1344_s7 }
 0x235   :  { %1270 = vrot.lane.b32.xlu0 %v1269_v27, %s1341_s28 }
 0x238   :  { %1255 = vrot.lane.b32.xlu1 %v1254_v1, %s1340_s27 }
 0x239   :  { %1275 = vrot.lane.b32.xlu0 %v1269_v27, %s1343_s30 }
 0x23c   :  { %1260 = vrot.lane.b32.xlu1 %v1254_v1, %s1341_s28 }
 0x23d   :  { %1285 = vrot.lane.b32.xlu0 %v1269_v27, %s1345_s8 }
 0x240   :  { %1265 = vrot.lane.b32.xlu1 %v1269_v27, %s1340_s27 }
 0x241   :  { %1300 = vrot.lane.b32.xlu0 %v1299_v32, %s1342_s29 }
 0x244   :  { %1280 = vrot.lane.b32.xlu1 %v1279_v26, %s1343_s30 }
 0x245   :  { %1305 = vrot.lane.b32.xlu0 %v1304_v58, %s1340_s27 }
 0x248   :  { %1290 = vrot.lane.b32.xlu1 %v1279_v26, %s1345_s8 }
 0x249   :  { %1310 = vrot.lane.b32.xlu0 %v1304_v58, %s1341_s28 }
 0x24c   :  { %1295 = vrot.lane.b32.xlu1 %v1294_v37, %s1339_s0 }
 0x24d   :  { %1315 = vrot.lane.b32.xlu0 %v1299_v32, %s1344_s7 }
 0x250   :  { %677 = vrot.lane.b32.xlu1 %v664_v50, %s1341_s28 }
 0x251   :  { %1330 = vrot.lane.b32.xlu0 %v1294_v37, %s1346_s9 }
 0x254   :  { %1320 = vrot.lane.b32.xlu1 %v1319_v59, %s1343_s30 }
 0x258   :  { %1325 = vrot.lane.b32.xlu1 %v1319_v59, %s1345_s8 }
 0x25c   :  { %793 = vrot.lane.b32.xlu1 %v604_v19, %s1346_s9 }
 0x297   :  { %v1785_v0 = vpop.permute.xlu0 %1225 }
 0x298   :  { %v1228_v15 = vunpack.i.h.bf16 %v1785_v0  ;;  %v1227_v16 = vunpack.i.l.bf16 %v1785_v0 }
 0x29a   :  { %v1787_v56 = vpop.permute.xlu1 %1220 }
 0x29b   :  { %v1789_v3 = vpop.permute.xlu0 %1230  ;;  %v1223_v21 = vunpack.i.h.bf16 %v1787_v56  ;;  %v1222_v22 = vunpack.i.l.bf16 %v1787_v56 }
 0x29c   :  { %v1233_v51 = vunpack.i.h.bf16 %v1789_v3  ;;  %v1232_v44 = vunpack.i.l.bf16 %v1789_v3 }
 0x29d   :  { %v652_v48 = vsel %vm110_vm3, %v1223_v21, %v1227_v16  ;;  %v654_v63 = vsel %vm110_vm3, %v1228_v15, %v1222_v22 }
 0x29e   :  { %v1791_v45 = vpop.permute.xlu1 %787  ;;  %v703_v50 = vsel %vm163_vm6, %v1232_v44, %v1233_v51 }
 0x29f   :  { %v1793_v38 = vpop.permute.xlu0 %1240 }
 0x2a0   :  { %v1243_v9 = vunpack.i.h.bf16 %v1793_v38  ;;  %v1242_v31 = vunpack.i.l.bf16 %v1793_v38 }
 0x2a2   :  { %v1795_v8 = vpop.permute.xlu1 %1235  ;;  %v749_v59 = vsel %vm211_vm8, %v1242_v31, %v1243_v9 }
 0x2a3   :  { %v1251_v4 = vpop.permute.xlu0 %1250 }
 0x2a4   :  { %v1253_v20 = vunpack.i.h.bf16 %v1251_v4  ;;  %v1252_v7 = vunpack.i.l.bf16 %v1251_v4 }
 0x2a6   :  { %v842_v5 = vpack.c.bf16 %v1252_v7, %v1252_v7  ;;  %v1797_v6 = vpop.permute.xlu1 %1245  ;;  %v795_v43 = vsel %vm259_vm5, %v1252_v7, %v1253_v20  ;;  %v796_v39 = vsel %vm259_vm5, %v1253_v20, %v1791_v45 }
 0x2a7   :  { %v1271_v55 = vpop.permute.xlu0 %1270  ;;  %v843_v11 = vpack.c.bf16 %v795_v43, %v795_v43  ;;  %v844_v13 = vpack.c.bf16 %v796_v39, %v796_v39 }
 0x2a8   :  { %895 = vrot.lane.b32.xlu0 %v842_v5, %s1347_s10  ;;  %v1273_v49 = vunpack.i.h.bf16 %v1271_v55  ;;  %v1272_v14 = vunpack.i.l.bf16 %v1271_v55 }
 0x2a9   :  { %897 = vrot.lane.b32.xlu1 %v843_v11, %s1347_s10 }
 0x2aa   :  { %v1804_v60 = vpop.permute.xlu1 %1255  ;;  %v680_v0 = vsel %vm138_vm2, %v1272_v14, %v1273_v49 }
 0x2ab   :  { %v1806_v35 = vpop.permute.xlu0 %1275  ;;  %v1258_v57 = vunpack.i.h.bf16 %v1804_v60  ;;  %v1257_v46 = vunpack.i.l.bf16 %v1804_v60 }
 0x2ac   :  { %899 = vrot.lane.b32.xlu0 %v844_v13, %s1347_s10  ;;  %v1277_v23 = vunpack.i.l.bf16 %v1806_v35  ;;  %v1278_v40 = vunpack.i.h.bf16 %v1806_v35 }
 0x2ae   :  { %v1816_v25 = vpop.permute.xlu1 %1260  ;;  %v818_v19 = vsel %vm271_vm1, %v1232_v44, %v1277_v23  ;;  %v726_v20 = vsel %vm187_vm7, %v1277_v23, %v1278_v40 }
 0x2af   :  { %v1263_v33 = vunpack.i.h.bf16 %v1816_v25  ;;  %v1262_v53 = vunpack.i.l.bf16 %v1816_v25  ;;  %v1822_v34 = vpop.permute.xlu0 %1285 }
 0x2b0   :  { %v1288_v61 = vunpack.i.h.bf16 %v1822_v34  ;;  %v1287_v18 = vunpack.i.l.bf16 %v1822_v34  ;;  %v1248_v34 = vunpack.i.h.bf16 %v1797_v6 }
 0x2b1   :  { %v679_v27 = vsel %vm138_vm2, %v1263_v33, %v1272_v14  ;;  %v681_v32 = vsel %vm138_vm2, %v1273_v49, %v1262_v53  ;;  %v1237_v33 = vunpack.i.l.bf16 %v1795_v8  ;;  %v819_v14 = vsel %vm271_vm1, %v703_v50, %v726_v20 }
 0x2b2   :  { %v1266_v1 = vpop.permute.xlu1 %1265  ;;  %v824_v28 = vsel %vm271_vm1, %v1242_v31, %v1287_v18  ;;  %v772_v4 = vsel %vm235_vm9, %v1287_v18, %v1288_v61  ;;  %v814_v39 = vsel %vm271_vm1, %v654_v63, %v681_v32  ;;  %v812_v13 = vsel %vm271_vm1, %v652_v48, %v679_v27 }
 0x2b3   :  { %v1268_v41 = vunpack.i.h.bf16 %v1266_v1  ;;  %v1267_v26 = vunpack.i.l.bf16 %v1266_v1  ;;  %v1839_v58 = vpop.permute.xlu0 %1300  ;;  %v836_v37 = vpack.c.bf16 %v824_v28, %v818_v19  ;;  %v825_v31 = vsel %vm271_vm1, %v749_v59, %v772_v4 }
 0x2b4   :  { %v1238_v28 = vunpack.i.h.bf16 %v1795_v8  ;;  %v704_v32 = vsel %vm163_vm6, %v1233_v51, %v1237_v33 }
 0x2b5   :  { %v631_v7 = vsel %vm86_vm4, %v1268_v41, %v1257_v46  ;;  %v629_v5 = vsel %vm86_vm4, %v1258_v57, %v1267_v26  ;;  %v630_v43 = vsel %vm86_vm4, %v1267_v26, %v1268_v41  ;;  %883 = vrot.lane.b32.xlu1 %v836_v37, %s1347_s10  ;;  %v837_v57 = vpack.c.bf16 %v825_v31, %v819_v14 }
 0x2b6   :  { %v1854_v55 = vpop.permute.xlu1 %1280  ;;  %v808_v11 = vsel %vm271_vm1, %v1730_v10, %v631_v7  ;;  %v806_v60 = vsel %vm271_vm1, %v1734_v17, %v629_v5  ;;  %v1247_v10 = vunpack.i.l.bf16 %v1797_v6  ;;  %v807_v49 = vsel %vm271_vm1, %v1728_v30, %v630_v43 }
 0x2b7   :  { %v1282_v35 = vunpack.i.l.bf16 %v1854_v55  ;;  %v1863_v21 = vpop.permute.xlu0 %1305  ;;  %v832_v44 = vpack.c.bf16 %v814_v39, %v808_v11  ;;  %v830_v23 = vpack.c.bf16 %v812_v13, %v806_v60  ;;  %v653_v17 = vsel %vm110_vm3, %v1227_v16, %v1228_v15 }
 0x2b8   :  { %v1283_v18 = vunpack.i.h.bf16 %v1854_v55  ;;  %v1307_v48 = vunpack.i.l.bf16 %v1863_v21  ;;  %v813_v27 = vsel %vm271_vm1, %v653_v17, %v680_v0  ;;  %v750_v41 = vsel %vm211_vm8, %v1243_v9, %v1247_v10 }
 0x2b9   :  { %875 = vrot.lane.b32.xlu1 %v832_v44, %s1347_s10  ;;  %871 = vrot.lane.b32.xlu0 %v830_v23, %s1347_s10  ;;  %v727_v1 = vsel %vm187_vm7, %v1278_v40, %v1282_v35  ;;  %v831_v19 = vpack.c.bf16 %v813_v27, %v807_v49  ;;  %v751_v40 = vsel %vm211_vm8, %v1247_v10, %v1248_v34  ;;  %v1308_v26 = vunpack.i.h.bf16 %v1863_v21 }
 0x2ba   :  { %v1877_v63 = vpop.permute.xlu1 %1290  ;;  %v728_v38 = vsel %vm187_vm7, %v1282_v35, %v1283_v18  ;;  %v632_v51 = vsel %vm86_vm4, %v1257_v46, %v1307_v48  ;;  %v820_v50 = vsel %vm271_vm1, %v704_v32, %v727_v1  ;;  %v705_v5 = vsel %vm163_vm6, %v1237_v33, %v1238_v28 }
 0x2bb   :  { %v1293_v30 = vunpack.i.h.bf16 %v1877_v63  ;;  %v1292_v15 = vunpack.i.l.bf16 %v1877_v63  ;;  %v1883_v16 = vpop.permute.xlu0 %1310  ;;  %v809_v39 = vsel %vm271_vm1, %v1739_v36, %v632_v51  ;;  %v821_v13 = vsel %vm271_vm1, %v705_v5, %v728_v38 }
 0x2bc   :  { %v1312_v3 = vunpack.i.l.bf16 %v1883_v16  ;;  %v633_v25 = vsel %vm86_vm4, %v1307_v48, %v1308_v26  ;;  %v1302_v36 = vunpack.i.l.bf16 %v1839_v58  ;;  %v1303_v17 = vunpack.i.h.bf16 %v1839_v58 }
 0x2bd   :  { %v773_v37 = vsel %vm235_vm9, %v1288_v61, %v1292_v15  ;;  %v774_v8 = vsel %vm235_vm9, %v1292_v15, %v1293_v30  ;;  %885 = vrot.lane.b32.xlu1 %v837_v57, %s1347_s10  ;;  %873 = vrot.lane.b32.xlu0 %v831_v19, %s1347_s10  ;;  %v1313_v61 = vunpack.i.h.bf16 %v1883_v16  ;;  %v810_v31 = vsel %vm271_vm1, %v1746_v42, %v633_v25 }
 0x2be   :  { %v1296_v9 = vpop.permute.xlu1 %1295  ;;  %v826_v59 = vsel %vm271_vm1, %v750_v41, %v773_v37  ;;  %v827_v7 = vsel %vm271_vm1, %v751_v40, %v774_v8  ;;  %v682_v43 = vsel %vm138_vm2, %v1262_v53, %v1312_v3  ;;  %v706_v27 = vsel %vm163_vm6, %v1238_v28, %v1302_v36 }
 0x2bf   :  { %v1298_v0 = vunpack.i.h.bf16 %v1296_v9  ;;  %v1297_v4 = vunpack.i.l.bf16 %v1296_v9  ;;  %v838_v20 = vpack.c.bf16 %v826_v59, %v820_v50  ;;  %v683_v56 = vsel %vm138_vm2, %v1312_v3, %v1313_v61  ;;  %v1316_v53 = vpop.permute.xlu0 %1315 }
 0x2c0   :  { %v839_v35 = vpack.c.bf16 %v827_v7, %v821_v13  ;;  %v1317_v14 = vunpack.i.l.bf16 %v1316_v53  ;;  %v1318_v48 = vunpack.i.h.bf16 %v1316_v53  ;;  %v707_v42 = vsel %vm163_vm6, %v1302_v36, %v1303_v17 }
 0x2c1   :  { %v655_v46 = vsel %vm110_vm3, %v1222_v22, %v1297_v4  ;;  %v656_v55 = vsel %vm110_vm3, %v1297_v4, %v1298_v0  ;;  %887 = vrot.lane.b32.xlu0 %v838_v20, %s1347_s10  ;;  %v811_v63 = vsel %vm271_vm1, %v1764_v62, %v1308_v26 }
 0x2c2   :  { %v678_v11 = vpop.permute.xlu1 %677  ;;  %v815_v60 = vsel %vm271_vm1, %v655_v46, %v682_v43  ;;  %v816_v44 = vsel %vm271_vm1, %v656_v55, %v683_v56  ;;  %v752_v58 = vsel %vm211_vm8, %v1248_v34, %v1317_v14  ;;  %v753_v37 = vsel %vm211_vm8, %v1317_v14, %v1318_v48 }
 0x2c3   :  { %v833_v22 = vpack.c.bf16 %v815_v60, %v809_v39  ;;  %v834_v49 = vpack.c.bf16 %v816_v44, %v810_v31  ;;  %v1331_v57 = vpop.permute.xlu0 %1330  ;;  %v684_v8 = vsel %vm138_vm2, %v1313_v61, %v678_v11  ;;  %v596_v31 = vld [vmem:[%s2027_s4] sm:$0xf] }
 0x2c4   :  { %v1333_v41 = vunpack.i.h.bf16 %v1331_v57  ;;  %v1332_v40 = vunpack.i.l.bf16 %v1331_v57  ;;  %v817_v50 = vsel %vm271_vm1, %v1298_v0, %v684_v8  ;;  %v597_v0 = vld [vmem:[%s2026_s5] sm:$0xff] }
 0x2c5   :  { %877 = vrot.lane.b32.xlu1 %v833_v22, %s1347_s10  ;;  %889 = vrot.lane.b32.xlu0 %v839_v35, %s1347_s10 }
 0x2c6   :  { %v1321_v23 = vpop.permute.xlu1 %1320  ;;  %v798_v59 = vsel %vm259_vm5, %v1332_v40, %v1333_v41  ;;  %v797_v4 = vsel %vm259_vm5, %v1791_v45, %v1332_v40 }
 0x2c7   :  { %v1323_v33 = vunpack.i.h.bf16 %v1321_v23  ;;  %v1322_v10 = vunpack.i.l.bf16 %v1321_v23  ;;  %v846_v61 = vpack.c.bf16 %v798_v59, %v798_v59  ;;  %v845_v7 = vpack.c.bf16 %v797_v4, %v797_v4 }
 0x2c9   :  { %879 = vrot.lane.b32.xlu0 %v834_v49, %s1347_s10  ;;  %v729_v15 = vsel %vm187_vm7, %v1283_v18, %v1322_v10  ;;  %v730_v16 = vsel %vm187_vm7, %v1322_v10, %v1323_v33 }
 0x2ca   :  { %v1326_v1 = vpop.permute.xlu1 %1325  ;;  %v822_v3 = vsel %vm271_vm1, %v706_v27, %v729_v15  ;;  %v823_v6 = vsel %vm271_vm1, %v707_v42, %v730_v16 }
 0x2cb   :  { %v1328_v19 = vunpack.i.h.bf16 %v1326_v1  ;;  %v1327_v32 = vunpack.i.l.bf16 %v1326_v1 }
 0x2cd   :  { %v775_v18 = vsel %vm235_vm9, %v1293_v30, %v1327_v32  ;;  %v776_v28 = vsel %vm235_vm9, %v1327_v32, %v1328_v19  ;;  %v835_v30 = vpack.c.bf16 %v817_v50, %v811_v63 }
 0x2ce   :  { %v828_v38 = vsel %vm271_vm1, %v752_v58, %v775_v18  ;;  %v829_v34 = vsel %vm271_vm1, %v753_v37, %v776_v28  ;;  %v794_v20 = vpop.permute.xlu1 %793 }
 0x2cf   :  { %v840_v51 = vpack.c.bf16 %v828_v38, %v822_v3  ;;  %v841_v9 = vpack.c.bf16 %v829_v34, %v823_v6  ;;  %v799_v21 = vsel %vm259_vm5, %v1333_v41, %v794_v20 }
 0x2d0   :  { %v847_v62 = vpack.c.bf16 %v799_v21, %v799_v21 }
 0x2d1   :  { %891 = vrot.lane.b32.xlu1 %v840_v51, %s1347_s10  ;;  %893 = vrot.lane.b32.xlu0 %v841_v9, %s1347_s10 }
 0x2d5   :  { %881 = vrot.lane.b32.xlu1 %v835_v30, %s1347_s10  ;;  %903 = vrot.lane.b32.xlu0 %v846_v61, %s1347_s10 }
 0x2d9   :  { %901 = vrot.lane.b32.xlu1 %v845_v7, %s1347_s10  ;;  %850 = vperm.xlu0 %1218, %v597_v0  }
 0x2dd   :  { %905 = vrot.lane.b32.xlu1 %v847_v62, %s1347_s10 }
 0x31a   :  { %v896_v26 = vpop.permute.xlu0 %895 }
 0x31b   :  { %v898_v45 = vpop.permute.xlu1 %897 }
 0x31c   :  { %v917_v22 = vsel %vm373_vm10, %v896_v26, %v898_v45 }
 0x31d   :  { %v938_v36 = vsel %vm405_vm11, %v917_v22, 0 }
 0x31e   :  { %v900_v5 = vpop.permute.xlu0 %899 }
 0x31f   :  { %v918_v35 = vsel %vm373_vm10, %v898_v45, %v900_v5 }
 0x327   :  { %v884_v43 = vpop.permute.xlu1 %883 }
 0x32b   :  { %v872_v46 = vpop.permute.xlu0 %871  ;;  %v876_v55 = vpop.permute.xlu1 %875 }
 0x32f   :  { %v874_v11 = vpop.permute.xlu0 %873  ;;  %v886_v13 = vpop.permute.xlu1 %885 }
 0x330   :  { %v907_v39 = vsel %vm373_vm10, %v872_v46, %v874_v11  ;;  %v908_v60 = vsel %vm373_vm10, %v874_v11, %v876_v55  ;;  %v912_v53 = vsel %vm373_vm10, %v884_v43, %v886_v13 }
 0x331   :  { %955 = vmatprep.subr.bf16.mxu1 %v908_v60 }
 0x332   :  { %956 = vmatpush1.bf16.msra.mxu1 %v907_v39 }
 0x333   :  { %v888_v25 = vpop.permute.xlu0 %887 }
 0x334   :  { %v913_v56 = vsel %vm373_vm10, %v886_v13, %v888_v25 }
 0x335   :  { %957 = vmatprep.subr.bf16.mxu1 %v913_v56 }
 0x336   :  { %958 = vmatpush1.bf16.msra.mxu1 %v912_v53 }
 0x337   :  { %1106 = vmatprep.subr.msk.bf16.mxu1 %vm405_vm11, %v918_v35  ;;  %v890_v44 = vpop.permute.xlu0 %889  ;;  %v878_v23 = vpop.permute.xlu1 %877 }
 0x338   :  { %v909_v49 = vsel %vm373_vm10, %v876_v55, %v878_v23  ;;  %v914_v48 = vsel %vm373_vm10, %v888_v25, %v890_v44 }
 0x33a   :  { %960 = vmatpush1.bf16.msra.mxu1 %v938_v36 }
 0x33b   :  { %v880_v33 = vpop.permute.xlu0 %879 }
 0x33c   :  { %v910_v10 = vsel %vm373_vm10, %v878_v23, %v880_v33 }
 0x33d   :  { %1107 = vmatmul.mubr.msk.bf16.vlgmr.msra.gmra.mrb[4].mxu1 %vm401_vm12, %v596_v31  ;;  %996 = vmatprep.subr.bf16.mxu0 %v910_v10 }
 0x33e   :  { %997 = vmatpush1.bf16.msra.mxu0 %v909_v49  ;;  %1069 = vmatprep.mubr.bf16.mxu1 %v1348_v52 }
 0x343   :  { %v892_v17 = vpop.permute.xlu1 %891  ;;  %v894_v57 = vpop.permute.xlu0 %893 }
 0x344   :  { %v915_v14 = vsel %vm373_vm10, %v890_v44, %v892_v17  ;;  %v916_v19 = vsel %vm373_vm10, %v892_v17, %v894_v57 }
 0x345   :  { %998 = vmatprep.subr.bf16.mxu0 %v915_v14 }
 0x346   :  { %999 = vmatpush1.bf16.msra.mxu0 %v914_v48 }
 0x347   :  { %v882_v27 = vpop.permute.xlu1 %881  ;;  %v904_v15 = vpop.permute.xlu0 %903 }
 0x348   :  { %v911_v1 = vsel %vm373_vm10, %v880_v33, %v882_v27  ;;  %1037 = vmatprep.subr.bf16.mxu1 %v882_v27 }
 0x349   :  { %1038 = vmatpush1.bf16.msra.mxu1 %v911_v1 }
 0x34a   :  { %1039 = vmatprep.subr.bf16.mxu1 %v894_v57 }
 0x34b   :  { %v902_v16 = vpop.permute.xlu1 %901 }
 0x34c   :  { %v919_v52 = vsel %vm373_vm10, %v900_v5, %v902_v16  ;;  %v920_v32 = vsel %vm373_vm10, %v902_v16, %v904_v15 }
 0x34d   :  { %v944_v42 = vsel %vm405_vm11, %v919_v52, 0  ;;  %1108 = vmatprep.subr.msk.bf16.mxu0 %vm405_vm11, %v920_v32  ;;  %1040 = vmatpush1.bf16.msra.mxu1 %v916_v19 }
 0x34e   :  { %1001 = vmatpush1.bf16.msra.mxu0 %v944_v42 }
 0x34f   :  { %v906_v58 = vpop.permute.xlu1 %905 }
 0x350   :  { %v921_v41 = vsel %vm373_vm10, %v904_v15, %v906_v58  ;;  %1110 = vmatprep.subr.msk.bf16.mxu1 %vm405_vm11, %v906_v58 }
 0x351   :  { %v950_v40 = vsel %vm405_vm11, %v921_v41, 0  ;;  %1109 = vmatmul.mubr.msk.bf16.vlgmr.msra.gmra.mrb[8].mxu0 %vm401_vm12, %v596_v31 }
 0x352   :  { %1042 = vmatpush1.bf16.msra.mxu1 %v950_v40 }
 0x355   :  { %1111 = vmatmul.mubr.msk.bf16.vlgmr.msra.gmra.mrb[8].mxu1 %vm401_vm12, %v596_v31 }
 0x358   :  { %v851_v37 = vpop.permute.xlu0 %850 }
 0x410   :  { %v989_v8 = vpop.f32.mrb[4].mxu1 }
 0x411   :  { %v990_v18 = vadd.f32 %v989_v8, %v851_v37  ;;  %v991_v28 = vpop.f32.mrb[5].mxu1 }
 0x412   :  { %v992_v3 = vadd.f32 %v991_v28, %v851_v37  ;;  %v993_v38 = vpop.f32.mrb[6].mxu1 }
 0x413   :  { %v1078_v6 = vmax.f32 %v990_v18, 0.0  ;;  %v994_v34 = vpop.f32.mrb[7].mxu1 }
 0x414   :  { %v1079_v51 = vmax.f32 %v992_v3, 0.0 }
 0x415   :  { %v1084_v9 = vmul.f32 %v1078_v6, %v1712_v2 }
 0x416   :  { %v1085_v50 = vmul.f32 %v1079_v51, %v1714_v47 }
 0x417   :  { %1090 = vst [vmem:[%s2028_s6] sm:$0xff] %v1084_v9 }
 0x418   :  { %1091 = vst [vmem:[%s2028_s6 + $0x8] sm:$0xff] %v1085_v50 }
 0x424   :  { %v1030_v59 = vpop.f32.mrb[8].mxu0 }
 0x425   :  { %v1031_v63 = vadd.f32 %v1030_v59, %v851_v37  ;;  %v1032_v30 = vpop.f32.mrb[9].mxu0 }
 0x426   :  { %v1033_v61 = vadd.f32 %v1032_v30, %v851_v37  ;;  %v1034_v4 = vpop.f32.mrb[10].mxu0 }
 0x427   :  { %v1080_v20 = vmax.f32 %v1031_v63, 0.0  ;;  %v1035_v0 = vpop.f32.mrb[11].mxu0 }
 0x428   :  { %v1081_v7 = vmax.f32 %v1033_v61, 0.0  ;;  %v1071_v21 = vpop.f32.mrb[8].mxu1 }
 0x429   :  { %v1086_v2 = vmul.f32 %v1080_v20, %v1716_v12  ;;  %v1072_v47 = vadd.f32 %v1071_v21, %v851_v37  ;;  %v1073_v62 = vpop.f32.mrb[9].mxu1 }
 0x42a   :  { %v1087_v26 = vmul.f32 %v1081_v7, %v1720_v54  ;;  %v1074_v45 = vadd.f32 %v1073_v62, %v851_v37  ;;  %v1075_v5 = vpop.f32.mrb[10].mxu1 }
 0x42b   :  { %1092 = vst [vmem:[%s2028_s6 + $0x10] sm:$0xff] %v1086_v2  ;;  %v1082_v43 = vmax.f32 %v1072_v47, 0.0  ;;  %v1076_v46 = vpop.f32.mrb[11].mxu1 }
 0x42c   :  { %1093 = vst [vmem:[%s2028_s6 + $0x18] sm:$0xff] %v1087_v26  ;;  %v1083_v55 = vmax.f32 %v1074_v45, 0.0 }
 0x42d   :  { %v1088_v11 = vmul.f32 %v1082_v43, %v1724_v24 }
 0x42e   :  { %v1089_v12 = vmul.f32 %v1083_v55, %v1726_v29 }
 0x42f   :  { %1094 = vst [vmem:[%s2028_s6 + $0x20] sm:$0xff] %v1088_v11 }
 0x430   :  { %1095 = vst.msk [vmem:[%s2028_s6 + $0x28] sm:$0xff] %vm31_vm13, %v1089_v12 }

</bundles_post_ra>
